<compile_context>
chip_gen: v5e
topology: v5e:2x2
jax: 0.10.0
libtpu: 0.0.40
codegen_flags: <defaults>
</compile_context>

<pallas_src>
import functools

import jax
import jax.numpy as jnp
from jax import lax
from jax.experimental import pallas as pl
from jax.experimental.pallas import tpu as pltpu

EPS = 1e-5
NEG_SLOPE = 0.2


def _round_up(x, m):
  return (x + m - 1) // m * m


def _pick_tm(msp, cin, k, width, cout, *, max_tm=4096,
             scratch_budget=24 * 1024 * 1024):
  """Largest lane tile (multiple of 128, <= max_tm) fitting the scratch budget.

  Large TM amortizes the per-tile slab halo ((k-1)*W + k-1 re-fetched elements)
  and the ~0.35us per-step overhead, and lengthens contiguous DMA rows.  The
  budget is chosen so slab double-buffer + double-buffered output block stay
  well under the 64 MiB physical VMEM of v7x (128 MiB on v5e/v6e).
  """
  tm = max(128, min(max_tm, _round_up(msp, 128)))

  def scratch_bytes(t):
    slab_len = _round_up(t + (k - 1) * width + (k - 1), 128)
    return (2 * cin * slab_len * 2      # double-buffered bf16 slab
            + 2 * cout * t * 4)         # double-buffered f32 output block

  while tm > 128 and scratch_bytes(tm) > scratch_budget:
    tm -= 128

  # Epilogue chunk: bound the live f32 register footprint of the LN chain.
  if tm % 512 == 0:
    chunk = 512
  elif tm % 256 == 0:
    chunk = 256
  else:
    chunk = 128
  return tm, min(chunk, tm)


def _conv_ln_lrelu_kernel(x_hbm, w_ref, p_ref, o_ref, slab, sem, *,
                          k, width, cin, cout, tm, slab_len, chunk):
  # x_hbm : (N, Cin, SPpad) bf16 in HBM (pl.ANY)  -- flattened spatial axis
  # w_ref : (Cout, K) bf16,  K = k*k*Cin ordered (kh, kw, ci)
  # p_ref : (Cout, 3) f32,   columns = [bias, gamma, beta]
  # o_ref : (Cout, TM)       lane-dense output block
  # slab  : (2, Cin, L) bf16 VMEM double buffer, sem: (2,) DMA semaphores
  n = pl.program_id(0)
  j = pl.program_id(1)
  n_tiles = pl.num_programs(1)
  slot = j % 2

  def slab_copy(batch, tile, buf):
    start = pl.multiple_of(tile * tm, 128)
    return pltpu.make_async_copy(
        x_hbm.at[batch, :, pl.ds(start, slab_len)],
        slab.at[buf], sem.at[buf])

  # Prime the pipeline at the first tile of each batch element this core runs
  # (no cross-batch prefetch => robust under megacore batch sharding).
  @pl.when(j == 0)
  def _():
    slab_copy(n, j, slot).start()       # j == 0  =>  slot == 0

  # Prefetch the next tile's slab (same batch element) into the other slot.
  @pl.when(j + 1 < n_tiles)
  def _():
    slab_copy(n, j + 1, 1 - slot).start()

  # Wait for the current slab (started either at j==0 or by j-1's prefetch).
  slab_copy(n, j, slot).wait()

  w = w_ref[...]                        # (Cout, K) bf16, resident
  prm = p_ref[...].astype(jnp.float32)  # (Cout, 3)
  bias, gamma, beta = prm[:, 0:1], prm[:, 1:2], prm[:, 2:3]

  # Fused im2col + conv: for each <=512-lane chunk of the tile, accumulate the
  # k*k statically shifted matmuls (shift = kh*W + kw) directly from the slab.
  for cbase in range(0, tm, chunk):
    acc = None
    for kh in range(k):
      for kw in range(k):
        kk = kh * k + kw
        shift = kh * width + kw + cbase
        xs = slab[slot, :, shift:shift + chunk]            # (Cin, chunk) bf16
        part = jnp.dot(w[:, kk * cin:(kk + 1) * cin], xs,
                       preferred_element_type=jnp.float32)  # MXU, f32 acc
        acc = part if acc is None else acc + part
    acc = acc + bias

    # Channel LayerNorm: channels live on the sublane axis (axis 0).
    mu = jnp.mean(acc, axis=0, keepdims=True)
    var = jnp.mean((acc - mu) ** 2, axis=0, keepdims=True)
    y = (acc - mu) * lax.rsqrt(var + EPS)
    y = y * gamma + beta

    # LeakyReLU(0.2); unmasked lane-dense store.
    o_ref[:, cbase:cbase + chunk] = jnp.where(
        y >= 0.0, y, NEG_SLOPE * y).astype(o_ref.dtype)


@functools.partial(jax.jit, static_argnames=("kernel_size", "stride", "padding"))
def conv2d_lrelu(x_nchw, w, b, gamma, beta, *, kernel_size=3, stride=1,
                 padding=0):
  """x_nchw: (N, Cin, H, W); w: (Cout, Cin, k, k) [PyTorch layouts]."""
  N, Cin, H, W = x_nchw.shape
  Cout = w.shape[0]
  k = kernel_size

  if padding:
    x_nchw = jnp.pad(
        x_nchw, ((0, 0), (0, 0), (padding, padding), (padding, padding)))
    H += 2 * padding
    W += 2 * padding

  Ho = H - k + 1                      # stride-1 "valid" output height
  Wo = W - k + 1
  K = k * k * Cin

  # The kernel computes a "full-width" plane of Ho*W flattened positions per
  # batch element; columns Wo..W-1 are garbage and are cropped afterwards.
  msp = Ho * W
  tm, chunk = _pick_tm(msp, Cin, k, W, Cout)
  msp_pad = _round_up(msp, tm)
  n_tiles = msp_pad // tm
  slab_len = _round_up(tm + (k - 1) * W + (k - 1), 128)
  sp_pad = (n_tiles - 1) * tm + slab_len        # >= H*W by construction

  # Single wrapper pass: cast to bf16 and pad the flattened spatial axis.
  x_flat = jnp.pad(x_nchw.reshape(N, Cin, H * W).astype(jnp.bfloat16),
                   ((0, 0), (0, 0), (0, sp_pad - H * W)))
  # (Cout, Cin, kh, kw) -> (Cout, kh, kw, Cin) -> (Cout, K), matching the
  # kernel's (kh, kw, ci) weight-column ordering.
  w_t = jnp.transpose(w, (0, 2, 3, 1)).reshape(Cout, K).astype(jnp.bfloat16)
  params = jnp.stack([b, gamma, beta], axis=1).astype(jnp.float32)  # (Cout, 3)

  kernel = functools.partial(_conv_ln_lrelu_kernel, k=k, width=W, cin=Cin,
                             cout=Cout, tm=tm, slab_len=slab_len, chunk=chunk)

  cost = pl.CostEstimate(
      flops=2 * N * msp_pad * K * Cout,
      transcendentals=0,
      bytes_accessed=(x_flat.size * 2 + w_t.size * 2 + params.size * 4
                      + N * Cout * msp_pad * 4))

  vmem_needed = (2 * Cin * slab_len * 2        # double-buffered bf16 slab
                 + 2 * Cout * tm * 4           # double-buffered out block
                 + Cout * K * 2 + Cout * 3 * 4)
  vmem_limit = max(16 << 20, min(48 << 20,
                                 _round_up(vmem_needed + (4 << 20), 1 << 20)))

  out = pl.pallas_call(
      kernel,
      out_shape=jax.ShapeDtypeStruct((N, Cout, msp_pad), x_nchw.dtype),
      grid_spec=pltpu.PrefetchScalarGridSpec(
          num_scalar_prefetch=0,
          grid=(N, n_tiles),
          in_specs=[
              pl.BlockSpec(memory_space=pl.ANY),              # x stays in HBM
              pl.BlockSpec((Cout, K), lambda n, j: (0, 0)),   # weights resident
              pl.BlockSpec((Cout, 3), lambda n, j: (0, 0)),   # bias/gamma/beta
          ],
          out_specs=pl.BlockSpec((None, Cout, tm), lambda n, j: (n, 0, j)),
          scratch_shapes=[
              pltpu.VMEM((2, Cin, slab_len), jnp.bfloat16),   # slab double buffer
              pltpu.SemaphoreType.DMA((2,)),
          ]),
      compiler_params=pltpu.CompilerParams(
          dimension_semantics=("parallel", "arbitrary"),
          vmem_limit_bytes=vmem_limit),
      cost_estimate=cost,
  )(x_flat, w_t, params)

  # Crop padding / garbage columns and reshape back to NCHW.
  # TODO(synk): fuse the crop into the consumer to avoid a second output pass.
  out = out[:, :, :msp].reshape(N, Cout, Ho, W)[:, :, :, :Wo]
  if stride != 1:
    # stride>1 output is an exact subsample of the stride-1 "valid" output.
    out = out[:, :, ::stride, ::stride]
  return out


def _reference(x_nchw, w, b, gamma, beta, kernel_size=3, stride=1, padding=0):
  """Pure-JAX reference mirroring PyTorch semantics.  Matmul operands are
  rounded to bf16 exactly like the kernel (accumulation in f32)."""
  xr = x_nchw.astype(jnp.bfloat16).astype(jnp.float32)
  wr = w.astype(jnp.bfloat16).astype(jnp.float32)
  y = lax.conv_general_dilated(
      xr, wr, window_strides=(stride, stride),
      padding=[(padding, padding), (padding, padding)],
      dimension_numbers=("NCHW", "OIHW", "NCHW"),
      precision=lax.Precision.HIGHEST)
  y = y + b.reshape(1, -1, 1, 1)
  mu = jnp.mean(y, axis=1, keepdims=True)
  var = jnp.mean((y - mu) ** 2, axis=1, keepdims=True)
  yn = (y - mu) * lax.rsqrt(var + EPS)
  yn = yn * gamma.reshape(1, -1, 1, 1) + beta.reshape(1, -1, 1, 1)
  return jnp.where(yn >= 0, yn, NEG_SLOPE * yn)


if __name__ == "__main__":
  key = jax.random.PRNGKey(0)
  k_x, k_w, k_b, k_g, k_be = jax.random.split(key, 5)

  N, Cin, H, W = 2, 4, 16, 16
  Cout, ksz, stride = 8, 3, 1

  x = jax.random.normal(k_x, (N, Cin, H, W), dtype=jnp.float32)
  conv_w = jax.random.normal(k_w, (Cout, Cin, ksz, ksz), dtype=jnp.float32) * 0.1
  conv_b = jax.random.normal(k_b, (Cout,), dtype=jnp.float32) * 0.1
  ln_gamma = 1.0 + 0.1 * jax.random.normal(k_g, (Cout,), dtype=jnp.float32)
  ln_beta = 0.1 * jax.random.normal(k_be, (Cout,), dtype=jnp.float32)

  out = conv2d_lrelu(x, conv_w, conv_b, ln_gamma, ln_beta,
                     kernel_size=ksz, stride=stride)
  out = jax.block_until_ready(out)

  ref = _reference(x, conv_w, conv_b, ln_gamma, ln_beta, ksz, stride)
  assert out.shape == (N, Cout, H - ksz + 1, W - ksz + 1), out.shape
  err = float(jnp.max(jnp.abs(out - ref)))
  assert err < 2e-3, err

  print("KERNEL_OK")
</pallas_src>

<mosaic_0001>
module attributes {stable_mosaic.version = 11 : i64} {
  func.func @_conv_ln_lrelu_kernel(%arg0: i32, %arg1: i32, %arg2: memref<2x4x384xbf16, #tpu.memory_space<any>>, %arg3: memref<8x36xbf16, #tpu.memory_space<vmem>>, %arg4: memref<8x3xf32, #tpu.memory_space<vmem>>, %arg5: memref<1x8x256xf32, #tpu.memory_space<vmem>>, %arg6: memref<2x4x384xbf16, #tpu.memory_space<vmem>>, %arg7: memref<2x!tpu.dma_semaphore, #tpu.memory_space<semaphore_mem>>) attributes {dimension_semantics = [#tpu.dimension_semantics<parallel>, #tpu.dimension_semantics<arbitrary>], iteration_bounds = array<i64: 2, 1>, scalar_prefetch = 0 : i64, scratch_operands = 2 : i64, tpu.core_type = #tpu.core_type<tc>, window_params = [{}, {pipeline_mode = #tpu.pipeline_mode<synchronous>, transform_indices = @transform_1, window_bounds = array<i64: 8, 36>}, {pipeline_mode = #tpu.pipeline_mode<synchronous>, transform_indices = @transform_2, window_bounds = array<i64: 8, 3>}, {transform_indices = @transform_3, window_bounds = array<i64: 1, 8, 256>}]} {
    %c2_i32 = arith.constant 2 : i32
    %c0_i32 = arith.constant 0 : i32
    %0 = arith.cmpi eq, %c2_i32, %c0_i32 : i32
    %c1_i32 = arith.constant 1 : i32
    %1 = arith.select %0, %c1_i32, %c2_i32 : i32
    %2 = arith.remsi %arg1, %1 : i32
    %c0_i32_0 = arith.constant 0 : i32
    %3 = arith.cmpi ne, %2, %c0_i32_0 : i32
    %c0_i32_1 = arith.constant 0 : i32
    %4 = arith.cmpi slt, %2, %c0_i32_1 : i32
    %c0_i32_2 = arith.constant 0 : i32
    %5 = arith.cmpi slt, %1, %c0_i32_2 : i32
    %6 = arith.xori %4, %5 : i1
    %7 = arith.andi %6, %3 : i1
    %8 = arith.addi %2, %1 : i32
    %9 = arith.select %7, %8, %2 : i32
    %c0_i32_3 = arith.constant 0 : i32
    %10 = arith.cmpi eq, %arg1, %c0_i32_3 : i32
    %11 = arith.extui %10 : i1 to i32
    %c0_i32_4 = arith.constant 0 : i32
    %12 = arith.cmpi ne, %11, %c0_i32_4 : i32
    scf.if %12 {
      %c256_i32_42 = arith.constant 256 : i32
      %115 = arith.muli %arg1, %c256_i32_42 : i32
      %116 = tpu.assume_multiple %115, 128 : i32
      %c0_i32_43 = arith.constant 0 : i32
      %117 = tpu.memref_slice %arg2[%arg0, %c0_i32_43, %116] : memref<2x4x384xbf16, #tpu.memory_space<any>> -> memref<1x4x384xbf16, #tpu.memory_space<any>>
      %118 = tpu.memref_squeeze %117 : memref<1x4x384xbf16, #tpu.memory_space<any>> -> memref<4x384xbf16, #tpu.memory_space<any>>
      %c0_i32_44 = arith.constant 0 : i32
      %c0_i32_45 = arith.constant 0 : i32
      %119 = tpu.memref_slice %arg6[%9, %c0_i32_44, %c0_i32_45] : memref<2x4x384xbf16, #tpu.memory_space<vmem>> -> memref<1x4x384xbf16, #tpu.memory_space<vmem>>
      %120 = tpu.memref_squeeze %119 : memref<1x4x384xbf16, #tpu.memory_space<vmem>> -> memref<4x384xbf16, #tpu.memory_space<vmem>>
      %121 = tpu.memref_slice %arg7[%9] : memref<2x!tpu.dma_semaphore, #tpu.memory_space<semaphore_mem>> -> memref<1x!tpu.dma_semaphore, #tpu.memory_space<semaphore_mem>>
      %122 = tpu.memref_squeeze %121 : memref<1x!tpu.dma_semaphore, #tpu.memory_space<semaphore_mem>> -> memref<!tpu.dma_semaphore, #tpu.memory_space<semaphore_mem>>
      tpu.enqueue_dma source(%118 : memref<4x384xbf16, #tpu.memory_space<any>>) target(%120 : memref<4x384xbf16, #tpu.memory_space<vmem>>) target_semaphore(%122 : memref<!tpu.dma_semaphore, #tpu.memory_space<semaphore_mem>>)
    } else {
    }
    %c1_i32_5 = arith.constant 1 : i32
    %13 = arith.addi %arg1, %c1_i32_5 : i32
    %c1_i32_6 = arith.constant 1 : i32
    %14 = arith.cmpi slt, %13, %c1_i32_6 : i32
    %15 = arith.extui %14 : i1 to i32
    %c0_i32_7 = arith.constant 0 : i32
    %16 = arith.cmpi ne, %15, %c0_i32_7 : i32
    scf.if %16 {
      %c1_i32_42 = arith.constant 1 : i32
      %115 = arith.addi %arg1, %c1_i32_42 : i32
      %c1_i32_43 = arith.constant 1 : i32
      %116 = arith.subi %c1_i32_43, %9 : i32
      %c256_i32_44 = arith.constant 256 : i32
      %117 = arith.muli %115, %c256_i32_44 : i32
      %118 = tpu.assume_multiple %117, 128 : i32
      %c0_i32_45 = arith.constant 0 : i32
      %119 = tpu.memref_slice %arg2[%arg0, %c0_i32_45, %118] : memref<2x4x384xbf16, #tpu.memory_space<any>> -> memref<1x4x384xbf16, #tpu.memory_space<any>>
      %120 = tpu.memref_squeeze %119 : memref<1x4x384xbf16, #tpu.memory_space<any>> -> memref<4x384xbf16, #tpu.memory_space<any>>
      %c0_i32_46 = arith.constant 0 : i32
      %c0_i32_47 = arith.constant 0 : i32
      %121 = tpu.memref_slice %arg6[%116, %c0_i32_46, %c0_i32_47] : memref<2x4x384xbf16, #tpu.memory_space<vmem>> -> memref<1x4x384xbf16, #tpu.memory_space<vmem>>
      %122 = tpu.memref_squeeze %121 : memref<1x4x384xbf16, #tpu.memory_space<vmem>> -> memref<4x384xbf16, #tpu.memory_space<vmem>>
      %123 = tpu.memref_slice %arg7[%116] : memref<2x!tpu.dma_semaphore, #tpu.memory_space<semaphore_mem>> -> memref<1x!tpu.dma_semaphore, #tpu.memory_space<semaphore_mem>>
      %124 = tpu.memref_squeeze %123 : memref<1x!tpu.dma_semaphore, #tpu.memory_space<semaphore_mem>> -> memref<!tpu.dma_semaphore, #tpu.memory_space<semaphore_mem>>
      tpu.enqueue_dma source(%120 : memref<4x384xbf16, #tpu.memory_space<any>>) target(%122 : memref<4x384xbf16, #tpu.memory_space<vmem>>) target_semaphore(%124 : memref<!tpu.dma_semaphore, #tpu.memory_space<semaphore_mem>>)
    } else {
    }
    %c256_i32 = arith.constant 256 : i32
    %17 = arith.muli %arg1, %c256_i32 : i32
    %18 = tpu.assume_multiple %17, 128 : i32
    %c0_i32_8 = arith.constant 0 : i32
    %19 = tpu.memref_slice %arg2[%arg0, %c0_i32_8, %18] : memref<2x4x384xbf16, #tpu.memory_space<any>> -> memref<1x4x384xbf16, #tpu.memory_space<any>>
    %20 = tpu.memref_squeeze %19 : memref<1x4x384xbf16, #tpu.memory_space<any>> -> memref<4x384xbf16, #tpu.memory_space<any>>
    %c0_i32_9 = arith.constant 0 : i32
    %c0_i32_10 = arith.constant 0 : i32
    %21 = tpu.memref_slice %arg6[%9, %c0_i32_9, %c0_i32_10] : memref<2x4x384xbf16, #tpu.memory_space<vmem>> -> memref<1x4x384xbf16, #tpu.memory_space<vmem>>
    %22 = tpu.memref_squeeze %21 : memref<1x4x384xbf16, #tpu.memory_space<vmem>> -> memref<4x384xbf16, #tpu.memory_space<vmem>>
    %23 = tpu.memref_slice %arg7[%9] : memref<2x!tpu.dma_semaphore, #tpu.memory_space<semaphore_mem>> -> memref<1x!tpu.dma_semaphore, #tpu.memory_space<semaphore_mem>>
    %24 = tpu.memref_squeeze %23 : memref<1x!tpu.dma_semaphore, #tpu.memory_space<semaphore_mem>> -> memref<!tpu.dma_semaphore, #tpu.memory_space<semaphore_mem>>
    tpu.wait_dma2 semaphore(%24 : memref<!tpu.dma_semaphore, #tpu.memory_space<semaphore_mem>>) src(%20 : memref<4x384xbf16, #tpu.memory_space<any>>) dst(%22 : memref<4x384xbf16, #tpu.memory_space<vmem>>)
    %c0 = arith.constant 0 : index
    %c0_11 = arith.constant 0 : index
    %25 = vector.load %arg3[%c0, %c0_11] : memref<8x36xbf16, #tpu.memory_space<vmem>>, vector<8x36xbf16>
    %c0_12 = arith.constant 0 : index
    %c0_13 = arith.constant 0 : index
    %26 = vector.load %arg4[%c0_12, %c0_13] : memref<8x3xf32, #tpu.memory_space<vmem>>, vector<8x3xf32>
    %27 = vector.extract_strided_slice %26 {offsets = [0, 0], sizes = [8, 1], strides = [1, 1]} : vector<8x3xf32> to vector<8x1xf32>
    %28 = vector.extract_strided_slice %26 {offsets = [0, 1], sizes = [8, 1], strides = [1, 1]} : vector<8x3xf32> to vector<8x1xf32>
    %29 = vector.extract_strided_slice %26 {offsets = [0, 2], sizes = [8, 1], strides = [1, 1]} : vector<8x3xf32> to vector<8x1xf32>
    %30 = arith.index_cast %9 : i32 to index
    %c0_14 = arith.constant 0 : index
    %c0_15 = arith.constant 0 : index
    %31 = vector.load %arg6[%30, %c0_14, %c0_15] : memref<2x4x384xbf16, #tpu.memory_space<vmem>>, vector<1x4x256xbf16>
    %32 = vector.shape_cast %31 : vector<1x4x256xbf16> to vector<4x256xbf16>
    %33 = vector.extract_strided_slice %25 {offsets = [0, 0], sizes = [8, 4], strides = [1, 1]} : vector<8x36xbf16> to vector<8x4xbf16>
    %cst = arith.constant dense<0.000000e+00> : vector<8x256xf32>
    %34 = tpu.matmul %33, %32, %cst {dimension_numbers = #tpu.dot_dimension_numbers<[1], [0], [0], [1], [0, 0, 1, 1], [], []>} : vector<8x4xbf16>, vector<4x256xbf16>, vector<8x256xf32> -> vector<8x256xf32>
    %35 = arith.index_cast %9 : i32 to index
    %c0_16 = arith.constant 0 : index
    %c1 = arith.constant 1 : index
    %36 = vector.load %arg6[%35, %c0_16, %c1] : memref<2x4x384xbf16, #tpu.memory_space<vmem>>, vector<1x4x256xbf16>
    %37 = vector.shape_cast %36 : vector<1x4x256xbf16> to vector<4x256xbf16>
    %38 = vector.extract_strided_slice %25 {offsets = [0, 4], sizes = [8, 4], strides = [1, 1]} : vector<8x36xbf16> to vector<8x4xbf16>
    %cst_17 = arith.constant dense<0.000000e+00> : vector<8x256xf32>
    %39 = tpu.matmul %38, %37, %cst_17 {dimension_numbers = #tpu.dot_dimension_numbers<[1], [0], [0], [1], [0, 0, 1, 1], [], []>} : vector<8x4xbf16>, vector<4x256xbf16>, vector<8x256xf32> -> vector<8x256xf32>
    %40 = arith.addf %34, %39 : vector<8x256xf32>
    %41 = arith.index_cast %9 : i32 to index
    %c0_18 = arith.constant 0 : index
    %c2 = arith.constant 2 : index
    %42 = vector.load %arg6[%41, %c0_18, %c2] : memref<2x4x384xbf16, #tpu.memory_space<vmem>>, vector<1x4x256xbf16>
    %43 = vector.shape_cast %42 : vector<1x4x256xbf16> to vector<4x256xbf16>
    %44 = vector.extract_strided_slice %25 {offsets = [0, 8], sizes = [8, 4], strides = [1, 1]} : vector<8x36xbf16> to vector<8x4xbf16>
    %cst_19 = arith.constant dense<0.000000e+00> : vector<8x256xf32>
    %45 = tpu.matmul %44, %43, %cst_19 {dimension_numbers = #tpu.dot_dimension_numbers<[1], [0], [0], [1], [0, 0, 1, 1], [], []>} : vector<8x4xbf16>, vector<4x256xbf16>, vector<8x256xf32> -> vector<8x256xf32>
    %46 = arith.addf %40, %45 : vector<8x256xf32>
    %47 = arith.index_cast %9 : i32 to index
    %c0_20 = arith.constant 0 : index
    %c16 = arith.constant 16 : index
    %48 = vector.load %arg6[%47, %c0_20, %c16] : memref<2x4x384xbf16, #tpu.memory_space<vmem>>, vector<1x4x256xbf16>
    %49 = vector.shape_cast %48 : vector<1x4x256xbf16> to vector<4x256xbf16>
    %50 = vector.extract_strided_slice %25 {offsets = [0, 12], sizes = [8, 4], strides = [1, 1]} : vector<8x36xbf16> to vector<8x4xbf16>
    %cst_21 = arith.constant dense<0.000000e+00> : vector<8x256xf32>
    %51 = tpu.matmul %50, %49, %cst_21 {dimension_numbers = #tpu.dot_dimension_numbers<[1], [0], [0], [1], [0, 0, 1, 1], [], []>} : vector<8x4xbf16>, vector<4x256xbf16>, vector<8x256xf32> -> vector<8x256xf32>
    %52 = arith.addf %46, %51 : vector<8x256xf32>
    %53 = arith.index_cast %9 : i32 to index
    %c0_22 = arith.constant 0 : index
    %c17 = arith.constant 17 : index
    %54 = vector.load %arg6[%53, %c0_22, %c17] : memref<2x4x384xbf16, #tpu.memory_space<vmem>>, vector<1x4x256xbf16>
    %55 = vector.shape_cast %54 : vector<1x4x256xbf16> to vector<4x256xbf16>
    %56 = vector.extract_strided_slice %25 {offsets = [0, 16], sizes = [8, 4], strides = [1, 1]} : vector<8x36xbf16> to vector<8x4xbf16>
    %cst_23 = arith.constant dense<0.000000e+00> : vector<8x256xf32>
    %57 = tpu.matmul %56, %55, %cst_23 {dimension_numbers = #tpu.dot_dimension_numbers<[1], [0], [0], [1], [0, 0, 1, 1], [], []>} : vector<8x4xbf16>, vector<4x256xbf16>, vector<8x256xf32> -> vector<8x256xf32>
    %58 = arith.addf %52, %57 : vector<8x256xf32>
    %59 = arith.index_cast %9 : i32 to index
    %c0_24 = arith.constant 0 : index
    %c18 = arith.constant 18 : index
    %60 = vector.load %arg6[%59, %c0_24, %c18] : memref<2x4x384xbf16, #tpu.memory_space<vmem>>, vector<1x4x256xbf16>
    %61 = vector.shape_cast %60 : vector<1x4x256xbf16> to vector<4x256xbf16>
    %62 = vector.extract_strided_slice %25 {offsets = [0, 20], sizes = [8, 4], strides = [1, 1]} : vector<8x36xbf16> to vector<8x4xbf16>
    %cst_25 = arith.constant dense<0.000000e+00> : vector<8x256xf32>
    %63 = tpu.matmul %62, %61, %cst_25 {dimension_numbers = #tpu.dot_dimension_numbers<[1], [0], [0], [1], [0, 0, 1, 1], [], []>} : vector<8x4xbf16>, vector<4x256xbf16>, vector<8x256xf32> -> vector<8x256xf32>
    %64 = arith.addf %58, %63 : vector<8x256xf32>
    %65 = arith.index_cast %9 : i32 to index
    %c0_26 = arith.constant 0 : index
    %c32 = arith.constant 32 : index
    %66 = vector.load %arg6[%65, %c0_26, %c32] : memref<2x4x384xbf16, #tpu.memory_space<vmem>>, vector<1x4x256xbf16>
    %67 = vector.shape_cast %66 : vector<1x4x256xbf16> to vector<4x256xbf16>
    %68 = vector.extract_strided_slice %25 {offsets = [0, 24], sizes = [8, 4], strides = [1, 1]} : vector<8x36xbf16> to vector<8x4xbf16>
    %cst_27 = arith.constant dense<0.000000e+00> : vector<8x256xf32>
    %69 = tpu.matmul %68, %67, %cst_27 {dimension_numbers = #tpu.dot_dimension_numbers<[1], [0], [0], [1], [0, 0, 1, 1], [], []>} : vector<8x4xbf16>, vector<4x256xbf16>, vector<8x256xf32> -> vector<8x256xf32>
    %70 = arith.addf %64, %69 : vector<8x256xf32>
    %71 = arith.index_cast %9 : i32 to index
    %c0_28 = arith.constant 0 : index
    %c33 = arith.constant 33 : index
    %72 = vector.load %arg6[%71, %c0_28, %c33] : memref<2x4x384xbf16, #tpu.memory_space<vmem>>, vector<1x4x256xbf16>
    %73 = vector.shape_cast %72 : vector<1x4x256xbf16> to vector<4x256xbf16>
    %74 = vector.extract_strided_slice %25 {offsets = [0, 28], sizes = [8, 4], strides = [1, 1]} : vector<8x36xbf16> to vector<8x4xbf16>
    %cst_29 = arith.constant dense<0.000000e+00> : vector<8x256xf32>
    %75 = tpu.matmul %74, %73, %cst_29 {dimension_numbers = #tpu.dot_dimension_numbers<[1], [0], [0], [1], [0, 0, 1, 1], [], []>} : vector<8x4xbf16>, vector<4x256xbf16>, vector<8x256xf32> -> vector<8x256xf32>
    %76 = arith.addf %70, %75 : vector<8x256xf32>
    %77 = arith.index_cast %9 : i32 to index
    %c0_30 = arith.constant 0 : index
    %c34 = arith.constant 34 : index
    %78 = vector.load %arg6[%77, %c0_30, %c34] : memref<2x4x384xbf16, #tpu.memory_space<vmem>>, vector<1x4x256xbf16>
    %79 = vector.shape_cast %78 : vector<1x4x256xbf16> to vector<4x256xbf16>
    %80 = vector.extract_strided_slice %25 {offsets = [0, 32], sizes = [8, 4], strides = [1, 1]} : vector<8x36xbf16> to vector<8x4xbf16>
    %cst_31 = arith.constant dense<0.000000e+00> : vector<8x256xf32>
    %81 = tpu.matmul %80, %79, %cst_31 {dimension_numbers = #tpu.dot_dimension_numbers<[1], [0], [0], [1], [0, 0, 1, 1], [], []>} : vector<8x4xbf16>, vector<4x256xbf16>, vector<8x256xf32> -> vector<8x256xf32>
    %82 = arith.addf %76, %81 : vector<8x256xf32>
    %83 = vector.broadcast %27 : vector<8x1xf32> to vector<8x256xf32>
    %84 = arith.addf %82, %83 : vector<8x256xf32>
    %cst_32 = arith.constant dense<0.000000e+00> : vector<256xf32>
    %85 = vector.multi_reduction <add>, %84, %cst_32 [0] : vector<8x256xf32> to vector<256xf32>
    %86 = vector.shape_cast %85 : vector<256xf32> to vector<1x256xf32>
    %cst_33 = arith.constant 8.000000e+00 : f32
    %87 = vector.broadcast %cst_33 : f32 to vector<1x256xf32>
    %88 = arith.divf %86, %87 : vector<1x256xf32>
    %89 = vector.broadcast %88 : vector<1x256xf32> to vector<8x256xf32>
    %90 = arith.subf %84, %89 : vector<8x256xf32>
    %91 = arith.mulf %90, %90 : vector<8x256xf32>
    %cst_34 = arith.constant dense<0.000000e+00> : vector<256xf32>
    %92 = vector.multi_reduction <add>, %91, %cst_34 [0] : vector<8x256xf32> to vector<256xf32>
    %93 = vector.shape_cast %92 : vector<256xf32> to vector<1x256xf32>
    %cst_35 = arith.constant 8.000000e+00 : f32
    %94 = vector.broadcast %cst_35 : f32 to vector<1x256xf32>
    %95 = arith.divf %93, %94 : vector<1x256xf32>
    %96 = vector.broadcast %88 : vector<1x256xf32> to vector<8x256xf32>
    %97 = arith.subf %84, %96 : vector<8x256xf32>
    %cst_36 = arith.constant 9.99999974E-6 : f32
    %98 = vector.broadcast %cst_36 : f32 to vector<1x256xf32>
    %99 = arith.addf %95, %98 : vector<1x256xf32>
    %100 = math.rsqrt %99 : vector<1x256xf32>
    %101 = vector.broadcast %100 : vector<1x256xf32> to vector<8x256xf32>
    %102 = arith.mulf %97, %101 : vector<8x256xf32>
    %103 = vector.broadcast %28 : vector<8x1xf32> to vector<8x256xf32>
    %104 = arith.mulf %102, %103 : vector<8x256xf32>
    %105 = vector.broadcast %29 : vector<8x1xf32> to vector<8x256xf32>
    %106 = arith.addf %104, %105 : vector<8x256xf32>
    %cst_37 = arith.constant 0.000000e+00 : f32
    %107 = vector.broadcast %cst_37 : f32 to vector<8x256xf32>
    %108 = arith.cmpf oge, %106, %107 : vector<8x256xf32>
    %cst_38 = arith.constant 2.000000e-01 : f32
    %109 = vector.broadcast %cst_38 : f32 to vector<8x256xf32>
    %110 = arith.mulf %109, %106 : vector<8x256xf32>
    %111 = arith.select %108, %106, %110 : vector<8x256xi1>, vector<8x256xf32>
    %c0_39 = arith.constant 0 : index
    %c0_40 = arith.constant 0 : index
    %c0_41 = arith.constant 0 : index
    %112 = vector.load %arg5[%c0_39, %c0_40, %c0_41] : memref<1x8x256xf32, #tpu.memory_space<vmem>>, vector<1x8x256xf32>
    %113 = vector.shape_cast %112 : vector<1x8x256xf32> to vector<8x256xf32>
    %114 = vector.shape_cast %111 : vector<8x256xf32> to vector<1x8x256xf32>
    tpu.vector_store %arg5[%c0_39, %c0_40, %c0_41], %114 {strides = array<i32>} : memref<1x8x256xf32, #tpu.memory_space<vmem>>, vector<1x8x256xf32>,
    return
  }
  func.func @transform_1(%arg0: i32, %arg1: i32) -> (i32, i32) {
    %c0_i32 = arith.constant 0 : i32
    %c0_i32_0 = arith.constant 0 : i32
    %c0_i32_1 = arith.constant 0 : i32
    return %c0_i32, %c0_i32_0 : i32, i32
  }
  func.func @transform_2(%arg0: i32, %arg1: i32) -> (i32, i32) {
    %c0_i32 = arith.constant 0 : i32
    %c0_i32_0 = arith.constant 0 : i32
    %c0_i32_1 = arith.constant 0 : i32
    return %c0_i32, %c0_i32_0 : i32, i32
  }
  func.func @transform_3(%arg0: i32, %arg1: i32) -> (i32, i32, i32) {
    %c0_i32 = arith.constant 0 : i32
    %c0_i32_0 = arith.constant 0 : i32
    return %arg0, %c0_i32, %arg1 : i32, i32, i32
  }
}

</mosaic_0001>

<bundles_post_ra>
// kernel: conv2d_lrelu.1
= control target key start
LH: loop header
LB: loop body
LE: loop exit
PB: predicated region body
PF: predicated region fallthrough
CT: control target
= control target key end

     0   :  { %s1117_s12 = smov 0   ;;  %s1119_s13 = smov 0   ;;  %s1233_s0 = inlined_call_operand.vmem [shape: bf16[2,4,384], index: 0, kind: input, shape index: {}]   ;;  %s1234_s1 = inlined_call_operand.vmem [shape: bf16[8,36], index: 1, kind: input, shape index: {}]   ;;  %s1235_s2 = inlined_call_operand.vmem [shape: f32[8,3], index: 2, kind: input, shape index: {}]   ;;  %s1236_s3 = inlined_call_operand.vmem [shape: f32[2,8,256], index: 3, kind: output, shape index: {}]  }
   0x1   :  { %s1121_s14 = smov 0  }
   0x2 LB: > { %s25_s15 = sadd.s32 1, %s1073_s13  ;;  %p969_p0 = scmp.ge.s32.totalorder %s1077_s14, 1  ;;  %s1077_s14 = sphi %s1121_s14, %s13_s14   ;;  %s1073_s13 = sphi %s1119_s13, %s1238_s13   ;;  %s1069_s12 = sphi %s1117_s12, %s1237_s12  }
   0x3   : > { %p27_p1 = scmp.ge.s32.totalorder %s25_s15, 2  ;;  %p117_p2 = scmp.lt.s32.totalorder %s1077_s14, 3 }
   0x5   : > { %s1240_s15 = smov (%p27_p1, %s25_s15), 0  ;;  %p118_p3 = pnand %p969_p0, %p117_p2 }
   0x6   : > { %p139_p4 = scmp.lt.s32.totalorder (!%p118_p3), %s1069_s12, 1  ;;  %s998_s16 = smul.u32 (!%p118_p3), 6, %s1069_s12 }
   0x7   : > { %121 = sbr.rel (%p118_p3) target bundleno = 422 (0x1a6), region = 28 }
   0x8   : > { %s171_s19 = scalar_lea.vmem (!%p118_p3), %s1233_s0, %s998_s16 }
   0xc   : > { %s1242_s12 = smov (!%p139_p4, %s1069_s12), 1  ;;  %v190_v0 = vld [vmem:[%s171_s19] sm:$0x3f] }
   0xd   : > { %s997_s20 = sshll.u32 %s1242_s12, 4  ;;  %191 = vst [vmem:[#allocation2] sm:$0x3f] %v190_v0 }
   0xe   : > { %s1141_s23 = scalar_lea.vmem %s1236_s3, %s997_s20 }
   0xf   : > { %209 = vsyncadd [#allocation3], 96 }
  0x10   : > { %1065 = dma.done.wait [#allocation3], 96 }
  0x11   : > { %1066 = vsyncadd [#allocation3], 4294967200  ;;  %v1146_v2 = vld [vmem:[%s1234_s1] sm:$0xf]  ;;  %s1079_s26 = smov 124   ;;  %s1080_s27 = smov 116  }
  0x12   : > { %v275_v3 = vunpack.c.l.b16 %v1146_v2  ;;  %s1081_s28 = smov 127   ;;  %s1082_s29 = smov 104   ;;  %vm300_vm0 = vcmask 1041408   ;;  %vm296_vm1 = vcmask 31744   ;;  %vm387_vm2 = vcmask 1031168  }
  0x13   : > { %s1083_s30 = smov 120   ;;  %s1084_s4 = smov 112   ;;  %vm293_vm3 = vcmask 1039360   ;;  %vm501_vm4 = vcmask 908288   ;;  %vm444_vm5 = vcmask 916480   ;;  %vm558_vm6 = vcmask 900096  }
  0x14   : > { %v273_v1 = vld [vmem:[#allocation2] sm:$0x3f]  ;;  %v1149_v4 = vpack.c.b16 %v275_v3, %v275_v3  ;;  %s1085_s5 = smov 126   ;;  %s1086_s6 = smov 108   ;;  %vm672_vm7 = vcmask 777216   ;;  %vm615_vm8 = vcmask 785408  }
  0x15   : > { %280 = vst [vmem:[#allocation1] ss:$4 sm:$0xff] %v273_v1  ;;  %v272_v5 = vld [vmem:[#allocation2] sm:$0xf]  ;;  %s1087_s7 = smov 100   ;;  %s1088_s8 = smov 111  }
  0x16   : > { %277 = vrot.lane.b32.xlu1 %v1149_v4, %s1079_s26  ;;  %428 = vrot.lane.b32.xlu2 %v1149_v4, %s1080_s27  ;;  %v370_v9 = vld [vmem:[#allocation2] sm:$0x3f]  ;;  %s1089_s9 = smov 110   ;;  %s1090_s10 = smov 96   ;;  %vm729_vm9 = vcmask 769024  }
  0x17   : > { %v427_v12 = vld [vmem:[#allocation2] sm:$0x3f]  ;;  %s1091_s11 = smov 95   ;;  %s1092_s12 = smov 94  }
  0x18   : > { %v484_v16 = vld [vmem:[#allocation2] sm:$0x3f] }
  0x19   : > { %v541_v20 = vld [vmem:[#allocation2] sm:$0x3f] }
  0x1a   : > { %v598_v24 = vld [vmem:[#allocation2] sm:$0x3f] }
  0x1b   : > { %v655_v28 = vld [vmem:[#allocation2] sm:$0x3f] }
  0x1c   : > { %v281_v6 = vld.sshfl [vmem:[#allocation1] sm:$0xff pattern:$0x73625140]  ;;  %v283_v7 = vld.sshfl [vmem:[#allocation1 + $0x8] sm:$0xff pattern:$0x73625140] }
  0x1d   : > { %287 = vrot.lane.b32.xlu0 %v281_v6, %s1081_s28  ;;  %v285_v8 = vld.sshfl [vmem:[#allocation1 + $0x10] sm:$0xff pattern:$0x73625140]  ;;  %v712_v32 = vld [vmem:[#allocation2] sm:$0x3f] }
  0x1e   : > { %334 = vst [vmem:[#allocation1] ss:$4 sm:$0xff] %v272_v5  ;;  %291 = vrot.lane.b32.xlu1 %v285_v8, %s1081_s28  ;;  %599 = vrot.lane.b32.xlu2 %v1149_v4, %s1082_s29 }
  0x25   : > { %289 = vrot.lane.b32.xlu0 %v283_v7, %s1081_s28  ;;  %v1154_v10 = vld.sshfl [vmem:[#allocation1] sm:$0xff pattern:$0x73625140]  ;;  %v1156_v11 = vld.sshfl [vmem:[#allocation1 + $0x8] sm:$0xff pattern:$0x73625140] }
  0x26   : > { %374 = vst [vmem:[#allocation1] ss:$4 sm:$0xff] %v370_v9  ;;  %371 = vrot.lane.b32.xlu1 %v1149_v4, %s1083_s30  ;;  %v340_v39 = vsel %vm300_vm0, %v1154_v10, 0  ;;  %v342_v40 = vsel %vm300_vm0, %v1156_v11, 0 }
  0x27   : > { %351 = vmatpush.bf16.msra.mxu2 %v340_v39  ;;  %364 = vmatpush.bf16.msra.mxu3 %v342_v40 }
  0x2a   : > { %977 = vmatmul.msk.bf16.vlgmr.msra.gmra.mxu2 %vm296_vm1, %v1146_v2  ;;  %978 = vmatmul.msk.bf16.vlgmr.msra.gmra.mxu3 %vm296_vm1, %v1146_v2 }
  0x2d   : > { %485 = vrot.lane.b32.xlu0 %v1149_v4, %s1084_s4  ;;  %v379_v13 = vld.sshfl [vmem:[#allocation1 + $0x10] sm:$0xff pattern:$0x73625140]  ;;  %v375_v14 = vld.sshfl [vmem:[#allocation1] sm:$0xff pattern:$0x73625140] }
  0x2e   : > { %v377_v15 = vld.sshfl [vmem:[#allocation1 + $0x8] sm:$0xff pattern:$0x73625140]  ;;  %381 = vrot.lane.b32.xlu2 %v375_v14, %s1085_s5  ;;  %542 = vrot.lane.b32.xlu1 %v1149_v4, %s1086_s6 }
  0x2f   : > { %431 = vst [vmem:[#allocation1] ss:$4 sm:$0xff] %v427_v12 }
  0x35   : > { %656 = vrot.lane.b32.xlu0 %v1149_v4, %s1087_s7 }
  0x36   : > { %v432_v17 = vld.sshfl [vmem:[#allocation1] sm:$0xff pattern:$0x73625140]  ;;  %v436_v18 = vld.sshfl [vmem:[#allocation1 + $0x10] sm:$0xff pattern:$0x73625140]  ;;  %383 = vrot.lane.b32.xlu2 %v377_v15, %s1085_s5 }
  0x37   : > { %v434_v19 = vld.sshfl [vmem:[#allocation1 + $0x8] sm:$0xff pattern:$0x73625140]  ;;  %442 = vrot.lane.b32.xlu1 %v436_v18, %s1084_s4  ;;  %v271_v18 = vld [vmem:[%s1235_s2] sm:$0xff] }
  0x38   : > { %488 = vst [vmem:[#allocation1] ss:$4 sm:$0xff] %v484_v16 }
  0x3d   : > { %385 = vrot.lane.b32.xlu0 %v379_v13, %s1085_s5 }
  0x3e   : > { %438 = vrot.lane.b32.xlu2 %v432_v17, %s1084_s4 }
  0x3f   : > { %v491_v21 = vld.sshfl [vmem:[#allocation1 + $0x8] sm:$0xff pattern:$0x73625140]  ;;  %v493_v22 = vld.sshfl [vmem:[#allocation1 + $0x10] sm:$0xff pattern:$0x73625140] }
  0x40   : > { %v489_v23 = vld.sshfl [vmem:[#allocation1] sm:$0xff pattern:$0x73625140]  ;;  %497 = vrot.lane.b32.xlu1 %v491_v21, %s1088_s8 }
  0x41   : > { %545 = vst [vmem:[#allocation1] ss:$4 sm:$0xff] %v541_v20 }
  0x45   : > { %440 = vrot.lane.b32.xlu0 %v434_v19, %s1084_s4  ;;  %v1093_v19 = vmov 0  }
  0x46   : > { %499 = vrot.lane.b32.xlu2 %v493_v22, %s1088_s8 }
  0x47   : > { %1043 = vset.pattern.permute.xlu2 %v1093_v19 }
  0x48   : > { %v548_v25 = vld.sshfl [vmem:[#allocation1 + $0x8] sm:$0xff pattern:$0x73625140]  ;;  %v546_v26 = vld.sshfl [vmem:[#allocation1] sm:$0xff pattern:$0x73625140] }
  0x49   : > { %552 = vrot.lane.b32.xlu1 %v546_v26, %s1089_s9  ;;  %v550_v27 = vld.sshfl [vmem:[#allocation1 + $0x10] sm:$0xff pattern:$0x73625140] }
  0x4a   : > { %602 = vst [vmem:[#allocation1] ss:$4 sm:$0xff] %v598_v24 }
  0x4d   : > { %495 = vrot.lane.b32.xlu0 %v489_v23, %s1088_s8 }
  0x4e   : > { %554 = vrot.lane.b32.xlu2 %v548_v25, %s1089_s9 }
  0x51   : > { %v603_v29 = vld.sshfl [vmem:[#allocation1] sm:$0xff pattern:$0x73625140]  ;;  %v607_v30 = vld.sshfl [vmem:[#allocation1 + $0x10] sm:$0xff pattern:$0x73625140] }
  0x52   : > { %613 = vrot.lane.b32.xlu1 %v607_v30, %s1090_s10  ;;  %v605_v31 = vld.sshfl [vmem:[#allocation1 + $0x8] sm:$0xff pattern:$0x73625140] }
  0x53   : > { %659 = vst [vmem:[#allocation1] ss:$4 sm:$0xff] %v655_v28 }
  0x55   : > { %556 = vrot.lane.b32.xlu0 %v550_v27, %s1089_s9 }
  0x56   : > { %609 = vrot.lane.b32.xlu2 %v603_v29, %s1090_s10 }
  0x5a   : > { %v664_v33 = vld.sshfl [vmem:[#allocation1 + $0x10] sm:$0xff pattern:$0x73625140]  ;;  %v662_v34 = vld.sshfl [vmem:[#allocation1 + $0x8] sm:$0xff pattern:$0x73625140] }
  0x5b   : > { %668 = vrot.lane.b32.xlu1 %v662_v34, %s1091_s11  ;;  %v660_v35 = vld.sshfl [vmem:[#allocation1] sm:$0xff pattern:$0x73625140] }
  0x5c   : > { %716 = vst [vmem:[#allocation1] ss:$4 sm:$0xff] %v712_v32 }
  0x5d   : > { %611 = vrot.lane.b32.xlu0 %v605_v31, %s1090_s10 }
  0x5e   : > { %670 = vrot.lane.b32.xlu2 %v664_v33, %s1091_s11 }
  0x63   : > { %v717_v36 = vld.sshfl [vmem:[#allocation1] sm:$0xff pattern:$0x73625140]  ;;  %v719_v37 = vld.sshfl [vmem:[#allocation1 + $0x8] sm:$0xff pattern:$0x73625140] }
  0x64   : > { %723 = vrot.lane.b32.xlu1 %v717_v36, %s1092_s12  ;;  %v721_v38 = vld.sshfl [vmem:[#allocation1 + $0x10] sm:$0xff pattern:$0x73625140] }
  0x65   : > { %666 = vrot.lane.b32.xlu0 %v660_v35, %s1091_s11 }
  0x66   : > { %725 = vrot.lane.b32.xlu2 %v719_v37, %s1092_s12 }
  0x6c   : > { %713 = vrot.lane.b32.xlu1 %v1149_v4, %s1090_s10 }
  0x6d   : > { %727 = vrot.lane.b32.xlu0 %v721_v38, %s1092_s12 }
  0x6e   : > { %771 = vperm.xlu2 %1043, %v271_v18  }
  0x70   : > { %v429_v41 = vpop.permute.xlu2 %428 }
  0x78   : > { %v1171_v42 = vpop.permute.xlu2 %599 }
  0x88   : > { %v382_v43 = vpop.permute.xlu2 %381  ;;  %v278_v44 = vpop.permute.xlu1 %277 }
  0x8f   : > { %v288_v45 = vpop.permute.xlu0 %287 }
  0x90   : > { %v384_v46 = vpop.permute.xlu2 %383  ;;  %v292_v47 = vpop.permute.xlu1 %291 }
  0x91   : > { %v388_v48 = vsel %vm387_vm2, %v382_v43, %v384_v46 }
  0x92   : > { %v394_v52 = vsel %vm300_vm0, %v388_v48, 0  ;;  %v1095_v48 = vmov 2  }
  0x93   : > { %1045 = vset.pattern.permute.xlu1 %v1095_v48 }
  0x94   : > { %846 = vperm.xlu1 %1045, %v271_v18  }
  0x97   : > { %v290_v49 = vpop.permute.xlu0 %289 }
  0x98   : > { %v294_v50 = vsel %vm293_vm3, %v288_v45, %v290_v49  ;;  %v295_v51 = vsel %vm293_vm3, %v290_v49, %v292_v47  ;;  %v372_v55 = vpop.permute.xlu1 %371  ;;  %v439_v57 = vpop.permute.xlu2 %438  ;;  %v1094_v47 = vmov 1  }
  0x99   : > { %v302_v53 = vsel %vm300_vm0, %v294_v50, 0  ;;  %v305_v54 = vsel %vm300_vm0, %v295_v51, 0  ;;  %1044 = vset.pattern.permute.xlu0 %v1094_v47 }
  0x9a   : > { %314 = vmatpush.bf16.msra.mxu0 %v302_v53  ;;  %327 = vmatpush.bf16.msra.mxu1 %v305_v54 }
  0x9b   : > { %840 = vperm.xlu0 %1044, %v271_v18  }
  0x9d   : > { %975 = vmatmul.msk.bf16.vlgmr.msra.gmra.mxu0 %vm296_vm1, %v278_v44  ;;  %976 = vmatmul.msk.bf16.vlgmr.msra.gmra.mxu1 %vm296_vm1, %v278_v44 }
  0x9e   : > { %406 = vmatpush.bf16.msrb.mxu0 %v394_v52 }
  0x9f   : > { %v486_v56 = vpop.permute.xlu0 %485 }
  0xa0   : > { %v543_v58 = vpop.permute.xlu1 %542  ;;  %v500_v61 = vpop.permute.xlu2 %499 }
  0xa3   : > { %1046 = vset.pattern.permute.xlu0 %v1095_v48 }
  0xa7   : > { %v1179_v59 = vpop.permute.xlu0 %656 }
  0xa8   : > { %v555_v4 = vpop.permute.xlu2 %554 }
  0xa9   : > { %v443_v60 = vpop.permute.xlu1 %442 }
  0xad   : > { %979 = vmatmul.msk.bf16.vlgmr.msrb.gmra.mxu0 %vm296_vm1, %v372_v55  ;;  %v353_v43 = vpop.f32.mrf.mxu2  ;;  %v366_v44 = vpop.f32.mrf.mxu3 }
  0xaf   : > { %v386_v62 = vpop.permute.xlu0 %385 }
  0xb0   : > { %v389_v63 = vsel %vm387_vm2, %v384_v46, %v386_v62  ;;  %v610_v15 = vpop.permute.xlu2 %609 }
  0xb1   : > { %v397_v0 = vsel %vm300_vm0, %v389_v63, 0 }
  0xb2   : > { %419 = vmatpush.bf16.msrb.mxu1 %v397_v0  ;;  %v498_v1 = vpop.permute.xlu1 %497 }
  0xb3   : > { %v503_v2 = vsel %vm501_vm4, %v498_v1, %v500_v61 }
  0xb4   : > { %v511_v3 = vsel %vm300_vm0, %v503_v2, 0 }
  0xb5   : > { %980 = vmatmul.msk.bf16.vlgmr.msrb.gmra.mxu1 %vm296_vm1, %v372_v55  ;;  %v355_v45 = vpop.f32.mrf.mxu2  ;;  %v368_v46 = vpop.f32.mrf.mxu3 }
  0xb6   : > { %533 = vmatpush.bf16.msra.mxu1 %v511_v3 }
  0xb7   : > { %v441_v5 = vpop.permute.xlu0 %440 }
  0xb8   : > { %v445_v6 = vsel %vm444_vm5, %v439_v57, %v441_v5  ;;  %v446_v7 = vsel %vm444_vm5, %v441_v5, %v443_v60  ;;  %v671_v23 = vpop.permute.xlu2 %670 }
  0xb9   : > { %v451_v8 = vsel %vm300_vm0, %v445_v6, 0  ;;  %v454_v9 = vsel %vm300_vm0, %v446_v7, 0 }
  0xba   : > { %463 = vmatpush.bf16.msrb.mxu2 %v451_v8  ;;  %476 = vmatpush.bf16.msrb.mxu3 %v454_v9 }
  0xbb   : > { %v553_v10 = vpop.permute.xlu1 %552 }
  0xbc   : > { %v559_v11 = vsel %vm558_vm6, %v553_v10, %v555_v4 }
  0xbd   : > { %981 = vmatmul.msk.bf16.vlgmr.msrb.gmra.mxu2 %vm296_vm1, %v429_v41  ;;  %982 = vmatmul.msk.bf16.vlgmr.msrb.gmra.mxu3 %vm296_vm1, %v429_v41  ;;  %v565_v12 = vsel %vm300_vm0, %v559_v11, 0  ;;  %v1096_v11 = vmov 8.0  }
  0xbe   : > { %577 = vmatpush.bf16.msra.mxu2 %v565_v12  ;;  %1047 = vrcp.f32 %v1096_v11 }
  0xbf   : > { %v496_v13 = vpop.permute.xlu0 %495 }
  0xc0   : > { %v502_v14 = vsel %vm501_vm4, %v496_v13, %v498_v1  ;;  %v726_v32 = vpop.permute.xlu2 %725 }
  0xc1   : > { %v508_v16 = vsel %vm300_vm0, %v502_v14, 0 }
  0xc2   : > { %520 = vmatpush.bf16.msra.mxu0 %v508_v16 }
  0xc4   : > { %v614_v17 = vpop.permute.xlu1 %613 }
  0xc5   : > { %983 = vmatmul.msk.bf16.vlgmr.msra.gmra.mxu0 %vm296_vm1, %v486_v56  ;;  %984 = vmatmul.msk.bf16.vlgmr.msra.gmra.mxu1 %vm296_vm1, %v486_v56 }
  0xc7   : > { %v557_v20 = vpop.permute.xlu0 %556 }
  0xc8   : > { %v560_v21 = vsel %vm558_vm6, %v555_v4, %v557_v20  ;;  %v1048_v20 = vpop.eup %1047 }
  0xc9   : > { %v568_v22 = vsel %vm300_vm0, %v560_v21, 0  ;;  %vm793_vm10 = vweird.f32 %v1048_v20 }
  0xca   : > { %590 = vmatpush.bf16.msra.mxu3 %v568_v22 }
  0xcd   : > { %985 = vmatmul.msk.bf16.vlgmr.msra.gmra.mxu2 %vm296_vm1, %v543_v58  ;;  %986 = vmatmul.msk.bf16.vlgmr.msra.gmra.mxu3 %vm296_vm1, %v543_v58  ;;  %v669_v24 = vpop.permute.xlu1 %668 }
  0xce   : > { %v674_v25 = vsel %vm672_vm7, %v669_v24, %v671_v23 }
  0xcf   : > { %v612_v26 = vpop.permute.xlu0 %611  ;;  %v682_v27 = vsel %vm300_vm0, %v674_v25, 0  ;;  %v789_v25 = vmul.f32 8.0, %v1048_v20 }
  0xd0   : > { %v617_v28 = vsel %vm615_vm8, %v612_v26, %v614_v17  ;;  %v616_v29 = vsel %vm615_vm8, %v610_v15, %v612_v26  ;;  %704 = vmatpush.bf16.msrb.mxu3 %v682_v27 }
  0xd1   : > { %v625_v30 = vsel %vm300_vm0, %v617_v28, 0  ;;  %v622_v31 = vsel %vm300_vm0, %v616_v29, 0  ;;  %v772_v28 = vpop.permute.xlu2 %771 }
  0xd2   : > { %634 = vmatpush.bf16.msrb.mxu0 %v622_v31  ;;  %647 = vmatpush.bf16.msrb.mxu1 %v625_v30 }
  0xd5   : > { %987 = vmatmul.msk.bf16.vlgmr.msrb.gmra.mxu0 %vm296_vm1, %v1171_v42  ;;  %988 = vmatmul.msk.bf16.vlgmr.msrb.gmra.mxu1 %vm296_vm1, %v1171_v42 }
  0xd6   : > { %v724_v33 = vpop.permute.xlu1 %723 }
  0xd7   : > { %v667_v34 = vpop.permute.xlu0 %666  ;;  %v730_v35 = vsel %vm729_vm9, %v724_v33, %v726_v32  ;;  %v790_v33 = vsub.f32 1.0, %v789_v25 }
  0xd8   : > { %v673_v36 = vsel %vm672_vm7, %v667_v34, %v669_v24  ;;  %v736_v37 = vsel %vm300_vm0, %v730_v35, 0 }
  0xd9   : > { %v679_v38 = vsel %vm300_vm0, %v673_v36, 0  ;;  %748 = vmatpush.bf16.msra.mxu0 %v736_v37 }
  0xda   : > { %691 = vmatpush.bf16.msrb.mxu2 %v679_v38 }
  0xdd   : > { %989 = vmatmul.msk.bf16.vlgmr.msrb.gmra.mxu2 %vm296_vm1, %v1179_v59  ;;  %990 = vmatmul.msk.bf16.vlgmr.msrb.gmra.mxu3 %vm296_vm1, %v1179_v59 }
  0xde   : > { %v714_v42 = vpop.permute.xlu1 %713 }
  0xdf   : > { %v728_v39 = vpop.permute.xlu0 %727 }
  0xe0   : > { %v731_v40 = vsel %vm729_vm9, %v726_v32, %v728_v39 }
  0xe1   : > { %v739_v41 = vsel %vm300_vm0, %v731_v40, 0  ;;  %v791_v40 = vmul.f32 %v1048_v20, %v790_v33 }
  0xe2   : > { %761 = vmatpush.bf16.msra.mxu1 %v739_v41 }
  0xe3   : > { %v792_v47 = vadd.f32 %v1048_v20, %v791_v40 }
  0xe5   : > { %991 = vmatmul.msk.bf16.vlgmr.msra.gmra.mxu0 %vm296_vm1, %v714_v42  ;;  %992 = vmatmul.msk.bf16.vlgmr.msra.gmra.mxu1 %vm296_vm1, %v714_v42 }
 0x10d   : > { %v841_v25 = vpop.permute.xlu0 %840 }
 0x11a   : > { %v316_v49 = vpop.f32.mrf.mxu0  ;;  %v329_v50 = vpop.f32.mrf.mxu1 }
 0x11b   : > { %v354_v3 = vadd.f32 %v353_v43, %v316_v49  ;;  %v367_v4 = vadd.f32 %v366_v44, %v329_v50 }
 0x122   : > { %v318_v51 = vpop.f32.mrf.mxu0  ;;  %v331_v52 = vpop.f32.mrf.mxu1 }
 0x123   : > { %v794_v52 = vsel %vm793_vm10, %v1048_v20, %v792_v47 }
 0x12a   : > { %v408_v53 = vpop.f32.mrf.mxu0 }
 0x12b   : > { %v425_v7 = vadd.f32 %v408_v53, %v354_v3 }
 0x132   : > { %v410_v54 = vpop.f32.mrf.mxu0  ;;  %v421_v55 = vpop.f32.mrf.mxu1 }
 0x133   : > { %v426_v8 = vadd.f32 %v421_v55, %v367_v4 }
 0x13a   : > { %v423_v56 = vpop.f32.mrf.mxu1 }
 0x140   : > { %v465_v57 = vpop.f32.mrf.mxu2  ;;  %v478_v58 = vpop.f32.mrf.mxu3 }
 0x141   : > { %v482_v9 = vadd.f32 %v465_v57, %v425_v7  ;;  %v483_v10 = vadd.f32 %v478_v58, %v426_v8 }
 0x142   : > { %v522_v59 = vpop.f32.mrf.mxu0  ;;  %v535_v60 = vpop.f32.mrf.mxu1 }
 0x143   : > { %v539_v14 = vadd.f32 %v522_v59, %v482_v9  ;;  %v540_v15 = vadd.f32 %v535_v60, %v483_v10 }
 0x148   : > { %v467_v61 = vpop.f32.mrf.mxu2  ;;  %v480_v62 = vpop.f32.mrf.mxu3 }
 0x14a   : > { %v524_v63 = vpop.f32.mrf.mxu0  ;;  %v537_v0 = vpop.f32.mrf.mxu1 }
 0x150   : > { %v579_v1 = vpop.f32.mrf.mxu2  ;;  %v592_v2 = vpop.f32.mrf.mxu3 }
 0x151   : > { %v596_v18 = vadd.f32 %v579_v1, %v539_v14  ;;  %v597_v19 = vadd.f32 %v592_v2, %v540_v15 }
 0x152   : > { %v636_v5 = vpop.f32.mrf.mxu0  ;;  %v649_v6 = vpop.f32.mrf.mxu1 }
 0x153   : > { %v653_v21 = vadd.f32 %v636_v5, %v596_v18  ;;  %v654_v22 = vadd.f32 %v649_v6, %v597_v19 }
 0x158   : > { %v581_v12 = vpop.f32.mrf.mxu2  ;;  %v594_v13 = vpop.f32.mrf.mxu3 }
 0x15a   : > { %v638_v16 = vpop.f32.mrf.mxu0  ;;  %v651_v17 = vpop.f32.mrf.mxu1 }
 0x160   : > { %v693_v23 = vpop.f32.mrf.mxu2  ;;  %v706_v24 = vpop.f32.mrf.mxu3 }
 0x161   : > { %v710_v26 = vadd.f32 %v693_v23, %v653_v21  ;;  %v711_v27 = vadd.f32 %v706_v24, %v654_v22 }
 0x162   : > { %v750_v29 = vpop.f32.mrf.mxu0  ;;  %v763_v30 = vpop.f32.mrf.mxu1 }
 0x163   : > { %v767_v31 = vadd.f32 %v750_v29, %v710_v26  ;;  %v768_v32 = vadd.f32 %v763_v30, %v711_v27  ;;  %v847_v30 = vpop.permute.xlu1 %846 }
 0x165   : > { %v774_v34 = vadd.f32 %v772_v28, %v767_v31  ;;  %v775_v35 = vadd.f32 %v772_v28, %v768_v32 }
 0x167   : > { %v776_v36 = vrot.slane %v774_v34, 4  ;;  %v782_v37 = vrot.slane %v775_v35, 4 }
 0x168   : > { %v695_v38 = vpop.f32.mrf.mxu2  ;;  %v708_v39 = vpop.f32.mrf.mxu3 }
 0x169   : > { %v777_v41 = vadd.f32 %v776_v36, %v774_v34  ;;  %v783_v42 = vadd.f32 %v782_v37, %v775_v35 }
 0x16a   : > { %v752_v43 = vpop.f32.mrf.mxu0  ;;  %v765_v44 = vpop.f32.mrf.mxu1 }
 0x16b   : > { %v778_v45 = vrot.slane %v777_v41, 2  ;;  %v784_v46 = vrot.slane %v783_v42, 2 }
 0x16d   : > { %v779_v48 = vadd.f32 %v778_v45, %v777_v41  ;;  %v785_v49 = vadd.f32 %v784_v46, %v783_v42 }
 0x16f   : > { %v780_v50 = vrot.slane %v779_v48, 1  ;;  %v786_v51 = vrot.slane %v785_v49, 1 }
 0x171   : > { %v781_v53 = vadd.f32 %v780_v50, %v779_v48  ;;  %v787_v54 = vadd.f32 %v786_v51, %v785_v49 }
 0x173   : > { %v795_v55 = vmul.f32 %v794_v52, %v781_v53  ;;  %v796_v56 = vmul.f32 %v794_v52, %v787_v54 }
 0x175   : > { %v797_v57 = vsub.f32 %v774_v34, %v795_v55  ;;  %v798_v58 = vsub.f32 %v775_v35, %v796_v56 }
 0x177   : > { %v799_v59 = vmul.f32 %v797_v57, %v797_v57  ;;  %v800_v60 = vmul.f32 %v798_v58, %v798_v58 }
 0x179   : > { %v801_v61 = vrot.slane %v799_v59, 4  ;;  %v807_v62 = vrot.slane %v800_v60, 4 }
 0x17b   : > { %v802_v63 = vadd.f32 %v801_v61, %v799_v59  ;;  %v808_v0 = vadd.f32 %v807_v62, %v800_v60 }
 0x17d   : > { %v803_v1 = vrot.slane %v802_v63, 2  ;;  %v809_v2 = vrot.slane %v808_v0, 2 }
 0x17f   : > { %v804_v3 = vadd.f32 %v803_v1, %v802_v63  ;;  %v810_v4 = vadd.f32 %v809_v2, %v808_v0 }
 0x181   : > { %v805_v5 = vrot.slane %v804_v3, 1  ;;  %v811_v6 = vrot.slane %v810_v4, 1 }
 0x183   : > { %v806_v7 = vadd.f32 %v805_v5, %v804_v3  ;;  %v812_v8 = vadd.f32 %v811_v6, %v810_v4 }
 0x185   : > { %v813_v9 = vmul.f32 %v806_v7, %v794_v52  ;;  %v814_v10 = vmul.f32 %v812_v8, %v794_v52 }
 0x187   : > { %v815_v11 = vadd.f32 1e-05, %v813_v9  ;;  %v816_v12 = vadd.f32 1e-05, %v814_v10 }
 0x189   : > { %1049 = vrsqrt.f32 %v815_v11  ;;  %vm823_vm13 = vweird.f32 %v815_v11  ;;  %vm833_vm15 = vweird.f32 %v816_v12 }
 0x18a   : > { %1051 = vrsqrt.f32 %v816_v12 }
 0x18f   : > { %v1050_v13 = vpop.eup %1049 }
 0x190   : > { %v1052_v14 = vpop.eup %1051  ;;  %v818_v15 = vmul.f32 %v1050_v13, %v815_v11  ;;  %vm824_vm11 = vweird.f32 %v1050_v13 }
 0x191   : > { %v828_v16 = vmul.f32 %v1052_v14, %v816_v12  ;;  %vm834_vm12 = vweird.f32 %v1052_v14  ;;  %vm825_vm14 = vmor %vm823_vm13, %vm824_vm11 }
 0x192   : > { %v819_v17 = vmul.f32 %v1050_v13, %v818_v15  ;;  %vm835_vm0 = vmor %vm833_vm15, %vm834_vm12 }
 0x193   : > { %v829_v18 = vmul.f32 %v1052_v14, %v828_v16 }
 0x194   : > { %v820_v19 = vmul.f32 0.5, %v819_v17 }
 0x195   : > { %v830_v20 = vmul.f32 0.5, %v829_v18 }
 0x196   : > { %v821_v21 = vsub.f32 1.5, %v820_v19 }
 0x197   : > { %v831_v22 = vsub.f32 1.5, %v830_v20 }
 0x198   : > { %v822_v23 = vmul.f32 %v1050_v13, %v821_v21 }
 0x199   : > { %v832_v24 = vmul.f32 %v1052_v14, %v831_v22 }
 0x19a   : > { %v826_v26 = vsel %vm825_vm14, %v1050_v13, %v822_v23 }
 0x19b   : > { %v836_v27 = vsel %vm835_vm0, %v1052_v14, %v832_v24  ;;  %v837_v28 = vmul.f32 %v826_v26, %v797_v57 }
 0x19c   : > { %v838_v29 = vmul.f32 %v836_v27, %v798_v58 }
 0x19d   : > { %v843_v31 = vmul.f32 %v841_v25, %v837_v28 }
 0x19e   : > { %v844_v32 = vmul.f32 %v841_v25, %v838_v29 }
 0x19f   : > { %v849_v33 = vadd.f32 %v847_v30, %v843_v31 }
 0x1a0   : > { %v850_v34 = vadd.f32 %v847_v30, %v844_v32 }
 0x1a1   : > { %vm851_vm1 = vcmp.ge.f32.partialorder %v849_v33, 0.0  ;;  %v853_v35 = vmul.f32 0.2, %v849_v33 }
 0x1a2   : > { %vm852_vm2 = vcmp.ge.f32.partialorder %v850_v34, 0.0  ;;  %v854_v36 = vmul.f32 0.2, %v850_v34 }
 0x1a3   : > { %v855_v37 = vsel %vm851_vm1, %v849_v33, %v853_v35 }
 0x1a4   : > { %v856_v38 = vsel %vm852_vm2, %v850_v34, %v854_v36  ;;  %857 = vst [vmem:[%s1141_s23] sm:$0xff] %v855_v37 }
 0x1a5   : > { %858 = vst [vmem:[%s1141_s23 + $0x8] sm:$0xff] %v856_v38 }
 0x1a6 PF: > { %s13_s14 = sadd.s32 1, %s1077_s14   ;;  %s1237_s12 = smov %s1073_s13 }
 0x1a7   : > { %p10_p5 = scmp.ge.s32.totalorder %s13_s14, 4   ;;  %s1238_s13 = smov %s1240_s15 }
 0x1a9   :  { %12 = sbr.rel (!%p10_p5) target bundleno = 2 (0x2), region = 140 }
 0x1ae   :  { %889 = vsyncmov [#allocation3] }
 0x1b1   :  { %s890_s18 = vpop.sfrf %889 }
 0x1b2   :  { %p995_p6 = scmp.ne.s32.totalorder %s890_s18, 0 }
 0x1b4   :  { %894 = shalt.err (%p995_p6)  }
 0x1b5   :  { %896 = vsyncmov [#allocation3 + $0x1] }
 0x1b8   :  { %s897_s19 = vpop.sfrf %896 }
 0x1b9   :  { %p996_p7 = scmp.ne.s32.totalorder %s897_s19, 0 }
 0x1bb   :  { %901 = shalt.err (%p996_p7)  }

</bundles_post_ra>
